<compile_context>
chip_gen: v5e
topology: v5e:2x2
jax: 0.10.0
libtpu: 0.0.40
codegen_flags: <defaults>
</compile_context>

<pallas_src>
import functools

import jax
import jax.numpy as jnp
from jax.experimental import pallas as pl
from jax.experimental.pallas import tpu as pltpu


def _label_smoothing_kernel(logits_ref, tgt_ref, out_ref,
                            m_sc, se_sc, sx_sc, tx_sc, *,
                            smoothing, ignore_index, n_classes, n_rows,
                            tile_rows, tile_classes, mask_classes):
    i = pl.program_id(0)          # row-tile index ("parallel")
    k = pl.program_id(1)          # class-tile index ("arbitrary", last)
    nk = pl.num_programs(1)

    @pl.when(k == 0)
    def _():
        m_sc[...] = jnp.full_like(m_sc, -jnp.inf)
        se_sc[...] = jnp.zeros_like(se_sc)
        sx_sc[...] = jnp.zeros_like(sx_sc)
        tx_sc[...] = jnp.zeros_like(tx_sc)

    x = logits_ref[...].astype(jnp.float32)              # (tm, tc) f32 compute
    tgt = tgt_ref[...]                                    # (tm, 1) int32

    # Class indices for this tile, kept (1, tc) so the compare against the
    # (tm, 1) targets broadcasts without materializing a (tm, tc) iota.
    cls = (jax.lax.broadcasted_iota(jnp.int32, (1, tile_classes), 1)
           + k * tile_classes)

    if mask_classes:
        # Last class tile is partial: OOB lanes carry undefined data.
        cvalid = cls < n_classes                          # (1, tc)
        x_max_src = jnp.where(cvalid, x, -jnp.inf)
        x_sum_src = jnp.where(cvalid, x, 0.0)
    else:
        x_max_src = x
        x_sum_src = x

    # Online logsumexp across class tiles.
    m_old = m_sc[...]
    m_new = jnp.maximum(m_old, jnp.max(x_max_src, axis=-1, keepdims=True))
    se_sc[...] = (se_sc[...] * jnp.exp(m_old - m_new)
                  + jnp.sum(jnp.exp(x_max_src - m_new), axis=-1, keepdims=True))
    m_sc[...] = m_new

    # Plain sum and target-select as lane reductions (no (tm, tc) weight array).
    sx_sc[...] = sx_sc[...] + jnp.sum(x_sum_src, axis=-1, keepdims=True)
    tx_sc[...] = tx_sc[...] + jnp.sum(jnp.where(cls == tgt, x, 0.0),
                                      axis=-1, keepdims=True)

    @pl.when(k == nk - 1)
    def _():
        # Row validity: inside the real array (partial last row tile) and not an
        # ignore_index position.  NOTE: this must remain a true select so that
        # NaN/Inf from undefined OOB rows cannot leak into the partial sums.
        row = jax.lax.broadcasted_iota(jnp.int32, tgt.shape, 0) + i * tile_rows
        valid = jnp.logical_and(row < n_rows, tgt != ignore_index)   # (tm, 1)

        lse = m_sc[...] + jnp.log(se_sc[...])
        uni = smoothing / n_classes
        dot_term = (1.0 - smoothing) * tx_sc[...] + uni * sx_sc[...]
        loss = jnp.where(valid, lse - dot_term, 0.0)

        partial_sum = jnp.sum(loss)
        partial_cnt = jnp.sum(valid.astype(jnp.float32))

        # Merged lane-dense per-tile output: sublane 0 = sum, sublane 1 = count.
        sub = jax.lax.broadcasted_iota(jnp.int32, out_ref.shape, 1)
        out_ref[...] = jnp.where(sub == 0, partial_sum, partial_cnt)


def label_smoothing_loss(logits, target, *, smoothing=0.1, ignore_index=-100,
                         tile_rows=None, tile_classes=None):
    """logits: [N, C] float (f32 or bf16), target: [N] int. Scalar f32 loss."""
    n, c = logits.shape
    target = target.astype(jnp.int32)

    # Pad up to the 8-row sublane minimum; padded rows carry ignore_index so
    # they contribute neither to the loss nor to the valid count.
    if n < 8:
        extra = 8 - n
        logits = jnp.pad(logits, ((0, extra), (0, 0)))
        target = jnp.pad(target, (0, extra), constant_values=ignore_index)
    n_padded = logits.shape[0]
    itemsize = jnp.dtype(logits.dtype).itemsize

    # ---- generation-aware VMEM budget --------------------------------------
    try:
        vmem_cap = int(pltpu.get_tpu_info().vmem_capacity_bytes)
    except Exception:
        vmem_cap = 64 * 1024 * 1024           # conservative (v7x per-TC VMEM)
    budget = int(vmem_cap * 0.6)              # working-set budget, headroom left
    vmem_limit = int(vmem_cap * 0.75)         # ~48 MiB on v7x, ~96 MiB on v5e/v6e

    # Full in-kernel working set per element: double-buffered input plus the
    # f32 upcast / exp / select temporaries (~16 B).  Per-row overhead covers
    # the 4 lane-padded (tm, 1) f32 scratch buffers and the lane-padded
    # (tm, 1) int32 target double-buffer.
    bytes_per_elem = 2 * itemsize + 16
    row_overhead = 4 * 128 * 4 + 2 * 128 * 4

    # ---- class tiling decision ----------------------------------------------
    if tile_classes is None:
        rows_with_full_c = budget // (c * bytes_per_elem + row_overhead)
        if rows_with_full_c >= 128:
            tile_classes = c                  # whole class dim in one block
        else:
            # class-tile so ~512-row tiles still fit the working-set budget
            tc = budget // (512 * bytes_per_elem)
            tile_classes = min(c, max(128, (tc // 128) * 128))
    tile_classes = min(int(tile_classes), c)
    if tile_classes < c:
        tile_classes = max(128, (tile_classes // 128) * 128)
    num_class_tiles = pl.cdiv(c, tile_classes)
    mask_classes = (num_class_tiles * tile_classes != c)

    # ---- row tiling ----------------------------------------------------------
    if tile_rows is None:
        tile_rows = budget // (tile_classes * bytes_per_elem + row_overhead)
        # Guarantee >= 2 row tiles whenever there are enough rows so the
        # "parallel" axis shards across both TensorCores on v7x.
        if n_padded >= 16:
            half = -(-((n_padded + 1) // 2) // 8) * 8
            tile_rows = min(tile_rows, half)
    tile_rows = int(tile_rows)
    tile_rows = min(tile_rows, -(-n_padded // 8) * 8)
    tile_rows = max(8, (tile_rows // 8) * 8)
    num_row_tiles = pl.cdiv(n_padded, tile_rows)

    tgt2d = target.reshape(n_padded, 1)

    kernel = functools.partial(
        _label_smoothing_kernel,
        smoothing=float(smoothing),
        ignore_index=int(ignore_index),
        n_classes=int(c),
        n_rows=int(n_padded),
        tile_rows=int(tile_rows),
        tile_classes=int(tile_classes),
        mask_classes=bool(mask_classes),
    )

    cost = pl.CostEstimate(
        flops=6 * n_padded * c,
        transcendentals=n_padded * c + n_padded,
        bytes_accessed=(n_padded * c * itemsize + n_padded * 4
                        + num_row_tiles * 2 * 128 * 4),
    )

    parts = pl.pallas_call(
        kernel,
        out_shape=jax.ShapeDtypeStruct((num_row_tiles, 2, 128), jnp.float32),
        grid_spec=pltpu.PrefetchScalarGridSpec(
            num_scalar_prefetch=0,
            grid=(num_row_tiles, num_class_tiles),
            in_specs=[
                pl.BlockSpec((tile_rows, tile_classes), lambda i, k: (i, k)),
                pl.BlockSpec((tile_rows, 1), lambda i, k: (i, 0)),
            ],
            out_specs=pl.BlockSpec((1, 2, 128), lambda i, k: (i, 0, 0)),
            scratch_shapes=[pltpu.VMEM((tile_rows, 1), jnp.float32)] * 4,
        ),
        compiler_params=pltpu.CompilerParams(
            dimension_semantics=("parallel", "arbitrary"),
            vmem_limit_bytes=vmem_limit,
        ),
        cost_estimate=cost,
    )(logits, tgt2d)

    # Tiny final reduction in plain XLA.
    loss_sum = jnp.sum(parts[:, 0, 0])
    valid_cnt = jnp.sum(parts[:, 1, 0])
    # Note: like the PyTorch reference, this is NaN if every target is ignored.
    return (loss_sum / valid_cnt).astype(jnp.float32)


def _reference(logits, target, smoothing=0.1, ignore_index=-100):
    pad = target == ignore_index
    tgt = jnp.where(pad, 0, target)
    logp = jax.nn.log_softmax(logits.astype(jnp.float32), axis=-1)
    c = logits.shape[-1]
    one_hot = jax.nn.one_hot(tgt, c, dtype=jnp.float32)
    smooth = one_hot * (1.0 - smoothing) + smoothing / c
    loss = -jnp.sum(logp * smooth, axis=-1)
    loss = jnp.where(pad, 0.0, loss)
    return loss.sum() / jnp.sum(~pad)


if __name__ == "__main__":
    key = jax.random.PRNGKey(0)
    k1, k2 = jax.random.split(key)

    # Case 1: small f32 case, single class tile, auto-split into 2 row tiles.
    N, C = 16, 128
    logits = jax.random.normal(k1, (N, C), dtype=jnp.float32)
    target = jax.random.randint(k2, (N,), 0, C, dtype=jnp.int32)
    target = target.at[3].set(-100).at[11].set(-100)   # ignored positions
    out = jax.block_until_ready(label_smoothing_loss(logits, target))
    ref = _reference(logits, target)
    assert jnp.allclose(out, ref, atol=1e-5, rtol=1e-5), (out, ref)

    # Case 2: bf16 logits, N not a multiple of the tile, explicit row tile.
    N2, C2 = 50, 384
    logits2 = jax.random.normal(k1, (N2, C2), dtype=jnp.bfloat16)
    target2 = jax.random.randint(k2, (N2,), 0, C2, dtype=jnp.int32)
    target2 = target2.at[0].set(-100).at[17].set(-100)
    out2 = jax.block_until_ready(
        label_smoothing_loss(logits2, target2, tile_rows=48))
    ref2 = _reference(logits2, target2)
    assert jnp.allclose(out2, ref2, atol=1e-4, rtol=1e-4), (out2, ref2)

    # Case 3: class-tiled online-logsumexp path with a partial last class tile.
    N3, C3 = 24, 1000
    logits3 = jax.random.normal(k1, (N3, C3), dtype=jnp.float32)
    target3 = jax.random.randint(k2, (N3,), 0, C3, dtype=jnp.int32)
    target3 = target3.at[5].set(-100)
    out3 = jax.block_until_ready(
        label_smoothing_loss(logits3, target3, tile_classes=256))
    ref3 = _reference(logits3, target3)
    assert jnp.allclose(out3, ref3, atol=1e-4, rtol=1e-4), (out3, ref3)

    print("KERNEL_OK")
</pallas_src>

<mosaic_0001>
module attributes {stable_mosaic.version = 11 : i64} {
  func.func @_label_smoothing_kernel(%arg0: i32, %arg1: i32, %arg2: memref<8x128xf32, #tpu.memory_space<vmem>>, %arg3: memref<8x1xi32, #tpu.memory_space<vmem>>, %arg4: memref<1x2x128xf32, #tpu.memory_space<vmem>>, %arg5: memref<8x1xf32, #tpu.memory_space<vmem>>, %arg6: memref<8x1xf32, #tpu.memory_space<vmem>>, %arg7: memref<8x1xf32, #tpu.memory_space<vmem>>, %arg8: memref<8x1xf32, #tpu.memory_space<vmem>>) attributes {dimension_semantics = [#tpu.dimension_semantics<parallel>, #tpu.dimension_semantics<arbitrary>], iteration_bounds = array<i64: 2, 1>, scalar_prefetch = 0 : i64, scratch_operands = 4 : i64, tpu.core_type = #tpu.core_type<tc>, window_params = [{transform_indices = @transform_0, window_bounds = array<i64: 8, 128>}, {transform_indices = @transform_1, window_bounds = array<i64: 8, 1>}, {transform_indices = @transform_2, window_bounds = array<i64: 1, 2, 128>}]} {
    %c0_i32 = arith.constant 0 : i32
    %0 = arith.cmpi eq, %arg1, %c0_i32 : i32
    %1 = arith.extui %0 : i1 to i32
    %c0_i32_0 = arith.constant 0 : i32
    %2 = arith.cmpi ne, %1, %c0_i32_0 : i32
    scf.if %2 {
      %cst_26 = arith.constant 0xFF800000 : f32
      %43 = vector.broadcast %cst_26 : f32 to vector<8x1xf32>
      %c0_27 = arith.constant 0 : index
      %c0_28 = arith.constant 0 : index
      %44 = vector.load %arg5[%c0_27, %c0_28] : memref<8x1xf32, #tpu.memory_space<vmem>>, vector<8x1xf32>
      tpu.vector_store %arg5[%c0_27, %c0_28], %43 {strides = array<i32>} : memref<8x1xf32, #tpu.memory_space<vmem>>, vector<8x1xf32>,
      %cst_29 = arith.constant 0.000000e+00 : f32
      %45 = vector.broadcast %cst_29 : f32 to vector<8x1xf32>
      %c0_30 = arith.constant 0 : index
      %c0_31 = arith.constant 0 : index
      %46 = vector.load %arg6[%c0_30, %c0_31] : memref<8x1xf32, #tpu.memory_space<vmem>>, vector<8x1xf32>
      tpu.vector_store %arg6[%c0_30, %c0_31], %45 {strides = array<i32>} : memref<8x1xf32, #tpu.memory_space<vmem>>, vector<8x1xf32>,
      %cst_32 = arith.constant 0.000000e+00 : f32
      %47 = vector.broadcast %cst_32 : f32 to vector<8x1xf32>
      %c0_33 = arith.constant 0 : index
      %c0_34 = arith.constant 0 : index
      %48 = vector.load %arg7[%c0_33, %c0_34] : memref<8x1xf32, #tpu.memory_space<vmem>>, vector<8x1xf32>
      tpu.vector_store %arg7[%c0_33, %c0_34], %47 {strides = array<i32>} : memref<8x1xf32, #tpu.memory_space<vmem>>, vector<8x1xf32>,
      %cst_35 = arith.constant 0.000000e+00 : f32
      %49 = vector.broadcast %cst_35 : f32 to vector<8x1xf32>
      %c0_36 = arith.constant 0 : index
      %c0_37 = arith.constant 0 : index
      %50 = vector.load %arg8[%c0_36, %c0_37] : memref<8x1xf32, #tpu.memory_space<vmem>>, vector<8x1xf32>
      tpu.vector_store %arg8[%c0_36, %c0_37], %49 {strides = array<i32>} : memref<8x1xf32, #tpu.memory_space<vmem>>, vector<8x1xf32>,
    } else {
    }
    %c0 = arith.constant 0 : index
    %c0_1 = arith.constant 0 : index
    %3 = vector.load %arg2[%c0, %c0_1] : memref<8x128xf32, #tpu.memory_space<vmem>>, vector<8x128xf32>
    %c0_2 = arith.constant 0 : index
    %c0_3 = arith.constant 0 : index
    %4 = vector.load %arg3[%c0_2, %c0_3] : memref<8x1xi32, #tpu.memory_space<vmem>>, vector<8x1xi32>
    %5 = tpu.iota {dimensions = array<i32: 1>} : vector<1x128xi32>
    %c128_i32 = arith.constant 128 : i32
    %6 = arith.muli %arg1, %c128_i32 : i32
    %7 = vector.broadcast %6 : i32 to vector<1x128xi32>
    %8 = arith.addi %5, %7 : vector<1x128xi32>
    %c0_4 = arith.constant 0 : index
    %c0_5 = arith.constant 0 : index
    %9 = vector.load %arg5[%c0_4, %c0_5] : memref<8x1xf32, #tpu.memory_space<vmem>>, vector<8x1xf32>
    %cst = arith.constant dense<0xFF800000> : vector<8xf32>
    %10 = vector.multi_reduction <maximumf>, %3, %cst [1] : vector<8x128xf32> to vector<8xf32>
    %11 = vector.shape_cast %10 : vector<8xf32> to vector<8x1xf32>
    %12 = arith.maximumf %9, %11 : vector<8x1xf32>
    %c0_6 = arith.constant 0 : index
    %c0_7 = arith.constant 0 : index
    %13 = vector.load %arg6[%c0_6, %c0_7] : memref<8x1xf32, #tpu.memory_space<vmem>>, vector<8x1xf32>
    %14 = arith.subf %9, %12 : vector<8x1xf32>
    %15 = math.exp %14 : vector<8x1xf32>
    %16 = arith.mulf %13, %15 : vector<8x1xf32>
    %17 = vector.broadcast %12 : vector<8x1xf32> to vector<8x128xf32>
    %18 = arith.subf %3, %17 : vector<8x128xf32>
    %19 = math.exp %18 : vector<8x128xf32>
    %cst_8 = arith.constant dense<0.000000e+00> : vector<8xf32>
    %20 = vector.multi_reduction <add>, %19, %cst_8 [1] : vector<8x128xf32> to vector<8xf32>
    %21 = vector.shape_cast %20 : vector<8xf32> to vector<8x1xf32>
    %22 = arith.addf %16, %21 : vector<8x1xf32>
    %c0_9 = arith.constant 0 : index
    %c0_10 = arith.constant 0 : index
    %23 = vector.load %arg6[%c0_9, %c0_10] : memref<8x1xf32, #tpu.memory_space<vmem>>, vector<8x1xf32>
    tpu.vector_store %arg6[%c0_9, %c0_10], %22 {strides = array<i32>} : memref<8x1xf32, #tpu.memory_space<vmem>>, vector<8x1xf32>,
    %c0_11 = arith.constant 0 : index
    %c0_12 = arith.constant 0 : index
    %24 = vector.load %arg5[%c0_11, %c0_12] : memref<8x1xf32, #tpu.memory_space<vmem>>, vector<8x1xf32>
    tpu.vector_store %arg5[%c0_11, %c0_12], %12 {strides = array<i32>} : memref<8x1xf32, #tpu.memory_space<vmem>>, vector<8x1xf32>,
    %c0_13 = arith.constant 0 : index
    %c0_14 = arith.constant 0 : index
    %25 = vector.load %arg7[%c0_13, %c0_14] : memref<8x1xf32, #tpu.memory_space<vmem>>, vector<8x1xf32>
    %cst_15 = arith.constant dense<0.000000e+00> : vector<8xf32>
    %26 = vector.multi_reduction <add>, %3, %cst_15 [1] : vector<8x128xf32> to vector<8xf32>
    %27 = vector.shape_cast %26 : vector<8xf32> to vector<8x1xf32>
    %28 = arith.addf %25, %27 : vector<8x1xf32>
    %c0_16 = arith.constant 0 : index
    %c0_17 = arith.constant 0 : index
    %29 = vector.load %arg7[%c0_16, %c0_17] : memref<8x1xf32, #tpu.memory_space<vmem>>, vector<8x1xf32>
    tpu.vector_store %arg7[%c0_16, %c0_17], %28 {strides = array<i32>} : memref<8x1xf32, #tpu.memory_space<vmem>>, vector<8x1xf32>,
    %c0_18 = arith.constant 0 : index
    %c0_19 = arith.constant 0 : index
    %30 = vector.load %arg8[%c0_18, %c0_19] : memref<8x1xf32, #tpu.memory_space<vmem>>, vector<8x1xf32>
    %31 = vector.broadcast %8 : vector<1x128xi32> to vector<8x128xi32>
    %32 = vector.broadcast %4 : vector<8x1xi32> to vector<8x128xi32>
    %33 = arith.cmpi eq, %31, %32 : vector<8x128xi32>
    %cst_20 = arith.constant 0.000000e+00 : f32
    %34 = vector.broadcast %cst_20 : f32 to vector<8x128xf32>
    %35 = arith.select %33, %3, %34 : vector<8x128xi1>, vector<8x128xf32>
    %cst_21 = arith.constant dense<0.000000e+00> : vector<8xf32>
    %36 = vector.multi_reduction <add>, %35, %cst_21 [1] : vector<8x128xf32> to vector<8xf32>
    %37 = vector.shape_cast %36 : vector<8xf32> to vector<8x1xf32>
    %38 = arith.addf %30, %37 : vector<8x1xf32>
    %c0_22 = arith.constant 0 : index
    %c0_23 = arith.constant 0 : index
    %39 = vector.load %arg8[%c0_22, %c0_23] : memref<8x1xf32, #tpu.memory_space<vmem>>, vector<8x1xf32>
    tpu.vector_store %arg8[%c0_22, %c0_23], %38 {strides = array<i32>} : memref<8x1xf32, #tpu.memory_space<vmem>>, vector<8x1xf32>,
    %c0_i32_24 = arith.constant 0 : i32
    %40 = arith.cmpi eq, %arg1, %c0_i32_24 : i32
    %41 = arith.extui %40 : i1 to i32
    %c0_i32_25 = arith.constant 0 : i32
    %42 = arith.cmpi ne, %41, %c0_i32_25 : i32
    scf.if %42 {
      %43 = tpu.iota {dimensions = array<i32: 0>} : vector<8x1xi32>
      %c8_i32 = arith.constant 8 : i32
      %44 = arith.muli %arg0, %c8_i32 : i32
      %45 = vector.broadcast %44 : i32 to vector<8x1xi32>
      %46 = arith.addi %43, %45 : vector<8x1xi32>
      %c16_i32 = arith.constant 16 : i32
      %47 = vector.broadcast %c16_i32 : i32 to vector<8x1xi32>
      %48 = arith.cmpi slt, %46, %47 : vector<8x1xi32>
      %c-100_i32 = arith.constant -100 : i32
      %49 = vector.broadcast %c-100_i32 : i32 to vector<8x1xi32>
      %50 = arith.cmpi ne, %4, %49 : vector<8x1xi32>
      %51 = arith.andi %48, %50 : vector<8x1xi1>
      %c0_26 = arith.constant 0 : index
      %c0_27 = arith.constant 0 : index
      %52 = vector.load %arg5[%c0_26, %c0_27] : memref<8x1xf32, #tpu.memory_space<vmem>>, vector<8x1xf32>
      %c0_28 = arith.constant 0 : index
      %c0_29 = arith.constant 0 : index
      %53 = vector.load %arg6[%c0_28, %c0_29] : memref<8x1xf32, #tpu.memory_space<vmem>>, vector<8x1xf32>
      %54 = math.log %53 : vector<8x1xf32>
      %55 = arith.addf %52, %54 : vector<8x1xf32>
      %c0_30 = arith.constant 0 : index
      %c0_31 = arith.constant 0 : index
      %56 = vector.load %arg8[%c0_30, %c0_31] : memref<8x1xf32, #tpu.memory_space<vmem>>, vector<8x1xf32>
      %cst_32 = arith.constant 0.899999976 : f32
      %57 = vector.broadcast %cst_32 : f32 to vector<8x1xf32>
      %58 = arith.mulf %57, %56 : vector<8x1xf32>
      %c0_33 = arith.constant 0 : index
      %c0_34 = arith.constant 0 : index
      %59 = vector.load %arg7[%c0_33, %c0_34] : memref<8x1xf32, #tpu.memory_space<vmem>>, vector<8x1xf32>
      %cst_35 = arith.constant 7.812500e-04 : f32
      %60 = vector.broadcast %cst_35 : f32 to vector<8x1xf32>
      %61 = arith.mulf %60, %59 : vector<8x1xf32>
      %62 = arith.addf %58, %61 : vector<8x1xf32>
      %63 = arith.subf %55, %62 : vector<8x1xf32>
      %cst_36 = arith.constant 0.000000e+00 : f32
      %64 = vector.broadcast %cst_36 : f32 to vector<8x1xf32>
      %65 = arith.select %51, %63, %64 : vector<8x1xi1>, vector<8x1xf32>
      %66 = vector.shape_cast %65 : vector<8x1xf32> to vector<1x8x1xf32>
      %cst_37 = arith.constant dense<0.000000e+00> : vector<1xf32>
      %67 = vector.multi_reduction <add>, %66, %cst_37 [1, 2] : vector<1x8x1xf32> to vector<1xf32>
      %68 = vector.shape_cast %67 : vector<1xf32> to vector<1x1x1xf32>
      %69 = vector.extract %68[0, 0, 0] : f32 from vector<1x1x1xf32>
      %70 = arith.extui %51 : vector<8x1xi1> to vector<8x1xi32>
      %71 = arith.sitofp %70 : vector<8x1xi32> to vector<8x1xf32>
      %72 = vector.shape_cast %71 : vector<8x1xf32> to vector<1x8x1xf32>
      %cst_38 = arith.constant dense<0.000000e+00> : vector<1xf32>
      %73 = vector.multi_reduction <add>, %72, %cst_38 [1, 2] : vector<1x8x1xf32> to vector<1xf32>
      %74 = vector.shape_cast %73 : vector<1xf32> to vector<1x1x1xf32>
      %75 = vector.extract %74[0, 0, 0] : f32 from vector<1x1x1xf32>
      %76 = tpu.iota {dimensions = array<i32: 1>} : vector<1x2x128xi32>
      %c0_i32_39 = arith.constant 0 : i32
      %77 = vector.broadcast %c0_i32_39 : i32 to vector<1x2x128xi32>
      %78 = arith.cmpi eq, %76, %77 : vector<1x2x128xi32>
      %79 = vector.broadcast %69 : f32 to vector<1x2x128xf32>
      %80 = vector.broadcast %75 : f32 to vector<1x2x128xf32>
      %81 = arith.select %78, %79, %80 : vector<1x2x128xi1>, vector<1x2x128xf32>
      %c0_40 = arith.constant 0 : index
      %c0_41 = arith.constant 0 : index
      %c0_42 = arith.constant 0 : index
      %82 = vector.load %arg4[%c0_40, %c0_41, %c0_42] : memref<1x2x128xf32, #tpu.memory_space<vmem>>, vector<1x2x128xf32>
      tpu.vector_store %arg4[%c0_40, %c0_41, %c0_42], %81 {strides = array<i32>} : memref<1x2x128xf32, #tpu.memory_space<vmem>>, vector<1x2x128xf32>,
    } else {
    }
    return
  }
  func.func @transform_0(%arg0: i32, %arg1: i32) -> (i32, i32) {
    %c0_i32 = arith.constant 0 : i32
    return %arg0, %arg1 : i32, i32
  }
  func.func @transform_1(%arg0: i32, %arg1: i32) -> (i32, i32) {
    %c0_i32 = arith.constant 0 : i32
    %c0_i32_0 = arith.constant 0 : i32
    return %arg0, %c0_i32 : i32, i32
  }
  func.func @transform_2(%arg0: i32, %arg1: i32) -> (i32, i32, i32) {
    %c0_i32 = arith.constant 0 : i32
    %c0_i32_0 = arith.constant 0 : i32
    %c0_i32_1 = arith.constant 0 : i32
    return %arg0, %c0_i32, %c0_i32_0 : i32, i32, i32
  }
}

</mosaic_0001>

<bundles_post_ra>
// kernel: tpu_custom_call.1
= control target key start
LH: loop header
LB: loop body
LE: loop exit
PB: predicated region body
PF: predicated region fallthrough
CT: control target
= control target key end

     0   :  { %7 = vsyncpa [#allocation7], 0  ;;  %s674_s0 = inlined_call_operand.vmem [shape: f32[16,128], index: 0, kind: input, shape index: {}]   ;;  %s675_s1 = inlined_call_operand.vmem [shape: s32[16,1], index: 1, kind: input, shape index: {}]   ;;  %s676_s2 = inlined_call_operand.hbm [shape: f32[2,2,128], index: 2, kind: output, shape index: {}]  }
   0x1   :  { %9 = vsyncpa [#allocation7 + $0x1], 0  ;;  %s563_s9 = smov 0   ;;  %s565_s10 = smov 0  }
   0x2   :  { %s567_s11 = smov 0   ;;  %s569_s12 = smov 0  }
   0x3   :  { %s571_s13 = smov 0   ;;  %s573_s14 = smov 0  }
   0x4 LB: > { %s381_s15 = sadd.s32 4294967295, %s543_s14   ;;  %s382_s16 = sadd.s32 4294967294, %s543_s14   ;;  %s543_s14 = sphi %s573_s14, %s15_s14   ;;  %s539_s13 = sphi %s571_s13, %s683_s13   ;;  %s535_s12 = sphi %s569_s12, %s682_s12   ;;  %s531_s11 = sphi %s567_s11, %s681_s11   ;;  %s527_s10 = sphi %s565_s10, %s680_s10   ;;  %s523_s9 = sphi %s563_s9, %s679_s9  }
   0x5   : > { %s27_s17 = sadd.s32 1, %s539_s13  ;;  %s88_s18 = sadd.s32 1, %s531_s11 }
   0x6   : > { %p29_p0 = scmp.ge.s32.totalorder %s27_s17, 2  ;;  %p98_p1 = scmp.ne.s32.totalorder %s531_s11, %s527_s10 }
   0x7   : > { %p99_p2 = scmp.eq.s32.totalorder %s381_s15, 1  ;;  %p104_p3 = scmp.ne.s32.totalorder %s527_s10, %s523_s9 }
   0x8   : > { %s685_s17 = smov (%p29_p0, %s27_s17), 0  ;;  %p105_p5 = scmp.eq.s32.totalorder %s382_s16, 1 }
   0x9   : > { %p603_p4 = por %p99_p2, %p98_p1  ;;  %s85_s20 = ssub.s32 %s539_s13, %s685_s17 }
   0xa   : > { %p385_p6 = scmp.ge.s32.totalorder %s543_s14, 1  ;;  %p86_p7 = scmp.eq.s32.totalorder %s85_s20, 0 }
   0xb   : > { %p610_p8 = por %p105_p5, %p104_p3  ;;  %p140_p9 = scmp.lt.s32.totalorder %s543_s14, 3 }
   0xc   : > { %s616_s22 = scalar_select %p86_p7, %s531_s11, %s88_s18  }
   0xd   : > { %p141_p10 = pnand %p385_p6, %p140_p9 }
   0xe   : > { %p168_p11 = scmp.lt.s32.totalorder (!%p141_p10), %s535_s12, 1  ;;  %s389_s3 = sshll.u32 (!%p141_p10), %s535_s12, 3 }
   0xf   : > { %144 = sbr.rel (%p141_p10) target bundleno = 601 (0x259), region = 28  ;;  %s165_s4 = sand.u32 (!%p141_p10), 1, %s527_s10  }
  0x10   : > { %s386_s5 = sshll.u32 (!%p141_p10), %s165_s4, 1  ;;  %s392_s6 = sshll.u32 (!%p141_p10), %s535_s12, 1 }
  0x11   : > { %s294_s15 = scalar_lea.hbm (!%p141_p10), %s676_s2, %s392_s6  ;;  %s167_s16 = scalar_lea.vmem (!%p141_p10), [#allocation6], %s386_s5 }
  0x12   : > { %s296_s18 = sshll.u32 (!%p141_p10), %s167_s16, 4  ;;  %s284_s25 = scalar_lea.sflag (!%p141_p10), [#allocation7], %s165_s4  ;;  %s297_s18 = int_to_ptr.vmem [resolvable:$true] %s296_s18 }
  0x13   : > { %s485_s29 = scalar_lea.hbm (!%p141_p10), %s676_s2, 4 }
  0x14   : > { %vm183_vm0 = vcmask 7168   ;;  %v545_v0 = vmov -inf   ;;  %s169_s23 = scalar_select %p168_p11, %s535_s12, 1  ;;  %v546_v2 = vmov 0   ;;  %v547_v3 = vmov 0.0  }
  0x15   : > { %184 = vst.msk [vmem:[#allocation2] sm:$0xff] %vm183_vm0, %v545_v0  ;;  %457 = vset.pattern.permute.xlu0 %v546_v2  ;;  %458 = vset.pattern.permute.xlu1 %v546_v2  ;;  %v190_v9 = vlaneseq  ;;  %v239_v31 = vstv %s389_s3 }
  0x16   : > { %s387_s24 = sshll.u32 %s169_s23, 3  ;;  %186 = vst.msk [vmem:[#allocation4] sm:$0xff] %vm183_vm0, %v547_v3  ;;  %s298_s23 = sshll.u32 %s294_s15, 4  ;;  %s299_s23 = int_to_ptr.hbm [resolvable:$true] %s298_s23 }
  0x17   : > { %s174_s27 = scalar_lea.vmem %s674_s0, %s387_s24  ;;  %s178_s30 = scalar_lea.vmem %s675_s1, %s387_s24  ;;  %185 = vst.msk [vmem:[#allocation3] sm:$0xff] %vm183_vm0, %v547_v3  ;;  %v191_v11 = vand.u32 127, %v190_v9  ;;  %v237_v29 = vshrl.u32 %v190_v9, 7 }
  0x18   : > { %v188_v1 = vld [vmem:[%s174_s27] sm:$0xff]  ;;  %187 = vst.msk [vmem:[#allocation5] sm:$0xff] %vm183_vm0, %v547_v3  ;;  %s479_s26 = sshra.s32 %s299_s23, 4  ;;  %s480_s26 = int_to_ptr.hbm [resolvable:$true] %s479_s26 }
  0x19   : > { %196 = vmax.xlane.f32.xlu0 %v188_v1  ;;  %219 = vadd.xlane.f32.xlu2 %v188_v1  ;;  %v189_v4 = vld [vmem:[%s178_s30] sm:$0xff]  ;;  %v240_v34 = vadd.s32 %v239_v31, %v237_v29  ;;  %vm278_vm5 = vcmp.eq.s32.totalorder %v237_v29, 0  ;;  %s481_s12 = scalar_lea.hbm %s480_s26, 2  ;;  %p486_p1 = scmp.lt.s32.totalorder %s480_s26, %s676_s2 }
  0x1a   : > { %225 = vperm.xlu1 %458, %v189_v4   ;;  %vm242_vm2 = vcmp.ne.s32.totalorder %v189_v4, 4294967196  ;;  %p482_p12 = scmp.ne.s32.totalorder %s480_s26, %s481_s12  ;;  %p487_p2 = scmp.lt.s32.totalorder %s485_s29, %s481_s12 }
  0x1b   : > { %vm241_vm3 = vcmp.lt.s32.totalorder %v240_v34, 16 }
  0x1c   : > { %v195_v5 = vld [vmem:[#allocation2] sm:$0xff]  ;;  %vm243_vm4 = vmand %vm241_vm3, %vm242_vm2  ;;  %p483_p13 = pnand %p482_p12, %p603_p4  ;;  %p488_p3 = por %p487_p2, %p486_p1 }
  0x1d   : > { %v218_v13 = vld [vmem:[#allocation4] sm:$0xff]  ;;  %v390_v45 = vsel %vm243_vm4, 1.0, %v547_v3 }
  0x1e   : > { %v199_v25 = vld [vmem:[#allocation3] sm:$0xff]  ;;  %v268_v46 = vsel %vm183_vm0, %v390_v45, 0.0  ;;  %p484_p0 = pneg %p483_p13 }
  0x1f   : > { %v223_v20 = vld [vmem:[#allocation5] sm:$0xff] }
  0x20   : > { %p489_p5 = pnand %p488_p3, %p484_p0 }
  0x8c   : > { %v197_v6 = vpop.xlane.xlu0 %196  ;;  %v226_v10 = vpop.permute.xlu1 %225 }
  0x8d   : > { %v198_v7 = vmax.f32 %v195_v5, %v197_v6  ;;  %vm227_vm1 = vcmp.eq.s32.totalorder %v191_v11, %v226_v10  ;;  %v220_v14 = vpop.xlane.xlu2 %219 }
  0x8e   : > { %v228_v12 = vsel %vm227_vm1, %v188_v1, 0.0  ;;  %v221_v15 = vadd.f32 %v220_v14, %v218_v13 }
  0x8f   : > { %v200_v8 = vsub.f32 %v195_v5, %v198_v7  ;;  %217 = vst.msk [vmem:[#allocation2] sm:$0xff] %vm183_vm0, %v198_v7  ;;  %206 = vperm.xlu0 %457, %v198_v7   ;;  %229 = vadd.xlane.f32.xlu2 %v228_v12 }
  0x90   : > { %222 = vst.msk [vmem:[#allocation4] sm:$0xff] %vm183_vm0, %v221_v15 }
  0x91   : > { %v201_v23 = vmul.f32 1.442695, %v200_v8 }
  0x96   : > { %v244_v39 = vld [vmem:[#allocation2] sm:$0xff] }
  0x97   : > { %v251_v33 = vld [vmem:[#allocation4] sm:$0xff] }
  0x98   : > { %v252_v36 = vmul.f32 0.00078125, %v251_v33 }
 0x101   : > { %v207_v16 = vpop.permute.xlu0 %206 }
 0x102   : > { %v209_v17 = vsub.f32 %v188_v1, %v207_v16  ;;  %v230_v21 = vpop.xlane.xlu2 %229 }
 0x103   : > { %v231_v22 = vadd.f32 %v230_v21, %v223_v20 }
 0x104   : > { %v210_v18 = vmul.f32 1.442695, %v209_v17 }
 0x105   : > { %232 = vst.msk [vmem:[#allocation5] sm:$0xff] %vm183_vm0, %v231_v22 }
 0x106   : > { %459 = vpow2.f32 %v210_v18 }
 0x107   : > { %461 = vpow2.f32 %v201_v23 }
 0x10c   : > { %v460_v19 = vpop.eup %459  ;;  %v249_v32 = vld [vmem:[#allocation5] sm:$0xff] }
 0x10d   : > { %212 = vadd.xlane.f32.xlu1 %v460_v19  ;;  %v462_v24 = vpop.eup %461  ;;  %v250_v35 = vmul.f32 0.9, %v249_v32 }
 0x10e   : > { %v203_v26 = vmul.f32 %v462_v24, %v199_v25 }
 0x10f   : > { %v253_v41 = vadd.f32 %v252_v36, %v250_v35 }
 0x180   : > { %v213_v27 = vpop.xlane.xlu1 %212 }
 0x181   : > { %v214_v28 = vadd.f32 %v213_v27, %v203_v26 }
 0x183   : > { %216 = vst.msk [vmem:[#allocation3] sm:$0xff] %vm183_vm0, %v214_v28 }
 0x18a   : > { %v245_v30 = vld [vmem:[#allocation3] sm:$0xff] }
 0x18b   : > { %463 = vlog2.f32 %v245_v30 }
 0x191   : > { %v464_v37 = vpop.eup %463 }
 0x192   : > { %v247_v38 = vmul.f32 0.6931472, %v464_v37 }
 0x194   : > { %v248_v40 = vadd.f32 %v247_v38, %v244_v39 }
 0x196   : > { %v254_v42 = vsub.f32 %v248_v40, %v253_v41 }
 0x198   : > { %v255_v43 = vsel %vm243_vm4, %v254_v42, 0.0 }
 0x199   : > { %v256_v44 = vsel %vm183_vm0, %v255_v43, 0.0 }
 0x19a   : > { %257 = vadd.xlane.f32.xlu2 %v256_v44 }
 0x1a2   : > { %269 = vadd.xlane.f32.xlu2 %v268_v46 }
 0x20d   : > { %v258_v47 = vpop.xlane.xlu2 %257 }
 0x20e   : > { %v259_v48 = vrot.slane %v258_v47, 4 }
 0x210   : > { %v260_v49 = vadd.f32 %v259_v48, %v258_v47 }
 0x212   : > { %v261_v50 = vrot.slane %v260_v49, 2 }
 0x214   : > { %v262_v51 = vadd.f32 %v261_v50, %v260_v49 }
 0x215   : > { %v270_v52 = vpop.xlane.xlu2 %269 }
 0x216   : > { %v271_v53 = vrot.slane %v270_v52, 4  ;;  %v263_v54 = vrot.slane %v262_v51, 1 }
 0x218   : > { %v272_v55 = vadd.f32 %v271_v53, %v270_v52  ;;  %v264_v56 = vadd.f32 %v263_v54, %v262_v51 }
 0x21a   : > { %v273_v57 = vrot.slane %v272_v55, 2  ;;  %395 = vpush %v264_v56 }
 0x21c   : > { %v274_v58 = vadd.f32 %v273_v57, %v272_v55 }
 0x21e   : > { %v275_v59 = vrot.slane %v274_v58, 1 }
 0x220   : > { %v276_v60 = vadd.f32 %v275_v59, %v274_v58 }
 0x222   : > { %397 = vpush %v276_v60 }
 0x24b   : > { %s396_s20 = spop %395 }
 0x24c   : > { %v279_v61 = vstv %s396_s20 }
 0x253   : > { %s398_s24 = spop %397 }
 0x254   : > { %v280_v62 = vstv %s398_s24 }
 0x255   : > { %v281_v63 = vsel %vm278_vm5, %v279_v61, %v280_v62 }
 0x256   : > { %282 = vst [vmem:[%s167_s16] sm:$0x3] %v281_v63 }
 0x257   : > { %492 = shalt.err (!%p489_p5)
}
 0x258   : > { %399 = dma.vmem_to_hbm [thread:$0]  (%p603_p4), %s297_s18, 32, %s299_s23, %s284_s25  }
 0x259 PF: > { %p405_p6 = scmp.ge.s32.totalorder %s543_s14, 2  ;;  %s310_s4 = sand.u32 1, %s523_s9  }
 0x25a   : > { %s311_s5 = scalar_lea.sflag [#allocation7], %s310_s4 }
 0x25b   : > { %p402_p7 = pnand %p405_p6, %p610_p8 }
 0x25d   : > { %p403_p9 = pneg %p402_p7 }
 0x25f   : > { %518 = dma.done.wait (%p403_p9), %s311_s5, 32  }
 0x260   : > { %520 = vsyncadd (%p403_p9), %s311_s5, 4294967264  ;;  %s15_s14 = sadd.s32 1, %s543_s14   ;;  %s679_s9 = smov %s527_s10 }
 0x261   : > { %p12_p10 = scmp.ge.s32.totalorder %s15_s14, 4   ;;  %s680_s10 = smov %s531_s11 }
 0x262   : > { %s681_s11 = smov %s616_s22  ;;  %s682_s12 = smov %s539_s13 }
 0x263   : > { %s683_s13 = smov %s685_s17  ;;  %14 = sbr.rel (!%p12_p10) target bundleno = 4 (0x4), region = 74 }
 0x268   :  { %317 = vsyncpa [#allocation7], 1 }
 0x269   :  { %319 = vsyncpa [#allocation7 + $0x1], 1 }

</bundles_post_ra>
